<compile_context>
chip_gen: v6e
topology: v6e:2x2x1
jax: 0.10.0
libtpu: 0.0.40
codegen_flags: <defaults>
</compile_context>

<pallas_src>
import jax
import jax.numpy as jnp
from jax.experimental import pallas as pl
from jax.experimental.pallas import tpu as pltpu

TEMPERATURE = 10.0  # module default __init__ arg
EPS = 1e-8          # present in the PyTorch module __init__ but unused in forward (kept for parity)

_NEG_PAD = -1e9                       # pad value (pre-temperature): exp underflows to 0
_VMEM_TILE_BUDGET = 6 * 1024 * 1024   # bytes for one (TM, Bp) f32 working slab


def _pick_block_rows(batch_size: int) -> int:
    """Row-tile size: single tile for small B, else a 128-multiple sized for VMEM."""
    if batch_size <= 256:
        return batch_size  # block dims equal to full array dims are always legal
    rows = _VMEM_TILE_BUDGET // (batch_size * 4)
    rows = min(rows, 256)
    rows = max(128, (rows // 128) * 128)  # keep the diag-block lane dim 128-aligned
    # TODO(synk): for extremely large B (>~48k) also tile the column (lane) axis
    # with a 2D grid + per-row online logsumexp to keep the slab inside VMEM.
    return int(rows)


def _make_kernel(batch_size: int, temperature: float, block_rows: int, padded_size: int):
    inv_b = 1.0 / float(batch_size)
    temp = float(temperature)

    def kernel(p_ref, d_ref, fwd_ref, bwd_ref, m_col, l_col, fwd_acc, diag_acc):
        i = pl.program_id(0)
        nsteps = pl.num_programs(0)

        @pl.when(i == 0)
        def _init():
            m_col[...] = jnp.full_like(m_col, -jnp.inf)
            l_col[...] = jnp.zeros_like(l_col)
            fwd_acc[0] = jnp.float32(0.0)
            diag_acc[0] = jnp.float32(0.0)

        p = p_ref[...].astype(jnp.float32) * temp              # (TM, Bp)

        # ---- forward direction: per-row logsumexp over all columns ----
        m_row = jnp.max(p, axis=1, keepdims=True)              # (TM, 1)
        lse_row = m_row + jnp.log(
            jnp.sum(jnp.exp(p - m_row), axis=1, keepdims=True))
        row_ids = i * block_rows + jax.lax.broadcasted_iota(
            jnp.int32, (block_rows, 1), 0)
        row_valid = row_ids < batch_size                        # masks padded rows
        fwd_acc[0] += jnp.sum(jnp.where(row_valid, lse_row, 0.0))

        # ---- diagonal of this row tile (shared by both loss directions) ----
        d = d_ref[...].astype(jnp.float32) * temp               # (TM, TM)
        dr = jax.lax.broadcasted_iota(jnp.int32, (block_rows, block_rows), 0)
        dc = jax.lax.broadcasted_iota(jnp.int32, (block_rows, block_rows), 1)
        diag_mask = jnp.logical_and(dr == dc, row_valid)
        diag_acc[0] += jnp.sum(jnp.where(diag_mask, d, 0.0))

        # ---- backward direction: online logsumexp over rows, per column ----
        tile_col_max = jnp.max(p, axis=0, keepdims=True)        # (1, Bp)
        m_new = jnp.maximum(m_col[...], tile_col_max)
        l_col[...] = (l_col[...] * jnp.exp(m_col[...] - m_new)
                      + jnp.sum(jnp.exp(p - m_new), axis=0, keepdims=True))
        m_col[...] = m_new

        @pl.when(i == nsteps - 1)
        def _finalize():
            lse_col = m_col[...] + jnp.log(l_col[...])           # (1, Bp)
            col_ids = jax.lax.broadcasted_iota(jnp.int32, (1, padded_size), 1)
            bwd_sum = jnp.sum(jnp.where(col_ids < batch_size, lse_col, 0.0))
            d_sum = diag_acc[0]
            fwd_ref[0] = (fwd_acc[0] - d_sum) * jnp.float32(inv_b)
            bwd_ref[0] = (bwd_sum - d_sum) * jnp.float32(inv_b)

    return kernel


def contrastive_loss(predictions: jax.Array, temperature: float = TEMPERATURE):
    """predictions: (B, B) similarity matrix. Returns (forward_loss, backward_loss)."""
    B = predictions.shape[0]
    assert predictions.ndim == 2 and predictions.shape[1] == B, (
        "ContrastiveLoss expects a square (B, B) similarity matrix")

    tm = _pick_block_rows(B)
    bp = ((B + tm - 1) // tm) * tm
    if bp != B:
        # Pad rows/cols with a very negative value so exp() underflows to 0;
        # padded rows/cols are additionally masked out inside the kernel.
        predictions = jnp.pad(
            predictions, ((0, bp - B), (0, bp - B)), constant_values=_NEG_PAD)

    kernel = _make_kernel(B, temperature, tm, bp)

    fwd, bwd = pl.pallas_call(
        kernel,
        out_shape=(
            jax.ShapeDtypeStruct((1,), jnp.float32),
            jax.ShapeDtypeStruct((1,), jnp.float32),
        ),
        grid_spec=pltpu.PrefetchScalarGridSpec(
            num_scalar_prefetch=0,
            grid=(bp // tm,),
            in_specs=[
                pl.BlockSpec((tm, bp), lambda i: (i, 0)),   # full row slab
                pl.BlockSpec((tm, tm), lambda i: (i, i)),   # diagonal block
            ],
            out_specs=(
                pl.BlockSpec(memory_space=pltpu.MemorySpace.SMEM),
                pl.BlockSpec(memory_space=pltpu.MemorySpace.SMEM),
            ),
            scratch_shapes=[
                pltpu.VMEM((1, bp), jnp.float32),   # running column max
                pltpu.VMEM((1, bp), jnp.float32),   # running column exp-sum
                pltpu.SMEM((1,), jnp.float32),      # forward logsumexp accumulator
                pltpu.SMEM((1,), jnp.float32),      # diagonal accumulator
            ],
        ),
        compiler_params=pltpu.CompilerParams(
            # Column accumulators carry across row tiles -> sequential axis.
            dimension_semantics=("arbitrary",),
            # Above default scoped limits on v5e/v6e, below v7x's 64 MiB physical.
            vmem_limit_bytes=48 * 1024 * 1024,
        ),
    )(predictions, predictions)
    return fwd[0], bwd[0]


def _reference(predictions: jax.Array, temperature: float = TEMPERATURE):
    """Plain-JAX reference mirroring F.cross_entropy semantics."""
    p = predictions.astype(jnp.float32) * temperature
    b = p.shape[0]
    labels = jnp.arange(b)
    fwd = jnp.mean(jax.nn.logsumexp(p, axis=1) - p[labels, labels])
    bwd = jnp.mean(jax.nn.logsumexp(p.T, axis=1) - p.T[labels, labels])
    return fwd, bwd


if __name__ == "__main__":
    key = jax.random.PRNGKey(0)
    B = 8  # small batch; similarity matrix is (B, B)
    predictions = jax.random.normal(key, (B, B), dtype=jnp.float32)

    fwd, bwd = contrastive_loss(predictions)
    jax.block_until_ready((fwd, bwd))

    fwd_ref, bwd_ref = _reference(predictions)
    assert jnp.allclose(fwd, fwd_ref, atol=1e-4, rtol=1e-4), (fwd, fwd_ref)
    assert jnp.allclose(bwd, bwd_ref, atol=1e-4, rtol=1e-4), (bwd, bwd_ref)

    print("KERNEL_OK")
</pallas_src>

<mosaic_0001>
module attributes {stable_mosaic.version = 11 : i64} {
  func.func @kernel(%arg0: i32, %arg1: memref<8x8xf32, #tpu.memory_space<vmem>>, %arg2: memref<8x8xf32, #tpu.memory_space<vmem>>, %arg3: memref<1xf32, #tpu.memory_space<smem>>, %arg4: memref<1xf32, #tpu.memory_space<smem>>, %arg5: memref<1x8xf32, #tpu.memory_space<vmem>>, %arg6: memref<1x8xf32, #tpu.memory_space<vmem>>, %arg7: memref<1xf32, #tpu.memory_space<smem>>, %arg8: memref<1xf32, #tpu.memory_space<smem>>) attributes {dimension_semantics = [#tpu.dimension_semantics<arbitrary>], iteration_bounds = array<i64: 1>, scalar_prefetch = 0 : i64, scratch_operands = 4 : i64, tpu.core_type = #tpu.core_type<tc>, window_params = [{transform_indices = @transform_0, window_bounds = array<i64: 8, 8>}, {transform_indices = @transform_1, window_bounds = array<i64: 8, 8>}, {transform_indices = @transform_2, window_bounds = array<i64: 1>}, {transform_indices = @transform_3, window_bounds = array<i64: 1>}]} {
    %c0_i32 = arith.constant 0 : i32
    %0 = arith.cmpi eq, %arg0, %c0_i32 : i32
    %1 = arith.extui %0 : i1 to i32
    %c0_i32_0 = arith.constant 0 : i32
    %2 = arith.cmpi ne, %1, %c0_i32_0 : i32
    scf.if %2 {
      %cst_30 = arith.constant 0xFF800000 : f32
      %67 = vector.broadcast %cst_30 : f32 to vector<1x8xf32>
      %c0_31 = arith.constant 0 : index
      %c0_32 = arith.constant 0 : index
      %68 = vector.load %arg5[%c0_31, %c0_32] : memref<1x8xf32, #tpu.memory_space<vmem>>, vector<1x8xf32>
      tpu.vector_store %arg5[%c0_31, %c0_32], %67 {strides = array<i32>} : memref<1x8xf32, #tpu.memory_space<vmem>>, vector<1x8xf32>,
      %cst_33 = arith.constant 0.000000e+00 : f32
      %69 = vector.broadcast %cst_33 : f32 to vector<1x8xf32>
      %c0_34 = arith.constant 0 : index
      %c0_35 = arith.constant 0 : index
      %70 = vector.load %arg6[%c0_34, %c0_35] : memref<1x8xf32, #tpu.memory_space<vmem>>, vector<1x8xf32>
      tpu.vector_store %arg6[%c0_34, %c0_35], %69 {strides = array<i32>} : memref<1x8xf32, #tpu.memory_space<vmem>>, vector<1x8xf32>,
      %cst_36 = arith.constant 0.000000e+00 : f32
      %c0_37 = arith.constant 0 : index
      %71 = memref.load %arg7[%c0_37] : memref<1xf32, #tpu.memory_space<smem>>
      memref.store %cst_36, %arg7[%c0_37] : memref<1xf32, #tpu.memory_space<smem>>
      %cst_38 = arith.constant 0.000000e+00 : f32
      %c0_39 = arith.constant 0 : index
      %72 = memref.load %arg8[%c0_39] : memref<1xf32, #tpu.memory_space<smem>>
      memref.store %cst_38, %arg8[%c0_39] : memref<1xf32, #tpu.memory_space<smem>>
    } else {
    }
    %c0 = arith.constant 0 : index
    %c0_1 = arith.constant 0 : index
    %3 = vector.load %arg1[%c0, %c0_1] : memref<8x8xf32, #tpu.memory_space<vmem>>, vector<8x8xf32>
    %cst = arith.constant 1.000000e+01 : f32
    %4 = vector.broadcast %cst : f32 to vector<8x8xf32>
    %5 = arith.mulf %3, %4 : vector<8x8xf32>
    %cst_2 = arith.constant dense<0xFF800000> : vector<8xf32>
    %6 = vector.multi_reduction <maximumf>, %5, %cst_2 [1] : vector<8x8xf32> to vector<8xf32>
    %7 = vector.shape_cast %6 : vector<8xf32> to vector<8x1xf32>
    %8 = vector.broadcast %7 : vector<8x1xf32> to vector<8x8xf32>
    %9 = arith.subf %5, %8 : vector<8x8xf32>
    %10 = math.exp %9 : vector<8x8xf32>
    %cst_3 = arith.constant dense<0.000000e+00> : vector<8xf32>
    %11 = vector.multi_reduction <add>, %10, %cst_3 [1] : vector<8x8xf32> to vector<8xf32>
    %12 = vector.shape_cast %11 : vector<8xf32> to vector<8x1xf32>
    %13 = math.log %12 : vector<8x1xf32>
    %14 = arith.addf %7, %13 : vector<8x1xf32>
    %c8_i32 = arith.constant 8 : i32
    %15 = arith.muli %arg0, %c8_i32 : i32
    %16 = tpu.iota {dimensions = array<i32: 0>} : vector<8x1xi32>
    %17 = vector.broadcast %15 : i32 to vector<8x1xi32>
    %18 = arith.addi %17, %16 : vector<8x1xi32>
    %c8_i32_4 = arith.constant 8 : i32
    %19 = vector.broadcast %c8_i32_4 : i32 to vector<8x1xi32>
    %20 = arith.cmpi slt, %18, %19 : vector<8x1xi32>
    %c0_5 = arith.constant 0 : index
    %21 = memref.load %arg7[%c0_5] : memref<1xf32, #tpu.memory_space<smem>>
    %cst_6 = arith.constant 0.000000e+00 : f32
    %22 = vector.broadcast %cst_6 : f32 to vector<8x1xf32>
    %23 = arith.select %20, %14, %22 : vector<8x1xi1>, vector<8x1xf32>
    %24 = vector.shape_cast %23 : vector<8x1xf32> to vector<1x8x1xf32>
    %cst_7 = arith.constant dense<0.000000e+00> : vector<1xf32>
    %25 = vector.multi_reduction <add>, %24, %cst_7 [1, 2] : vector<1x8x1xf32> to vector<1xf32>
    %26 = vector.shape_cast %25 : vector<1xf32> to vector<1x1x1xf32>
    %27 = vector.extract %26[0, 0, 0] : f32 from vector<1x1x1xf32>
    %28 = arith.addf %21, %27 : f32
    %c0_8 = arith.constant 0 : index
    %29 = memref.load %arg7[%c0_8] : memref<1xf32, #tpu.memory_space<smem>>
    memref.store %28, %arg7[%c0_8] : memref<1xf32, #tpu.memory_space<smem>>
    %c0_9 = arith.constant 0 : index
    %c0_10 = arith.constant 0 : index
    %30 = vector.load %arg2[%c0_9, %c0_10] : memref<8x8xf32, #tpu.memory_space<vmem>>, vector<8x8xf32>
    %cst_11 = arith.constant 1.000000e+01 : f32
    %31 = vector.broadcast %cst_11 : f32 to vector<8x8xf32>
    %32 = arith.mulf %30, %31 : vector<8x8xf32>
    %33 = tpu.iota {dimensions = array<i32: 0>} : vector<8x8xi32>
    %34 = tpu.iota {dimensions = array<i32: 1>} : vector<8x8xi32>
    %35 = arith.cmpi eq, %33, %34 : vector<8x8xi32>
    %36 = vector.broadcast %20 : vector<8x1xi1> to vector<8x8xi1>
    %37 = arith.andi %35, %36 : vector<8x8xi1>
    %c0_12 = arith.constant 0 : index
    %38 = memref.load %arg8[%c0_12] : memref<1xf32, #tpu.memory_space<smem>>
    %cst_13 = arith.constant 0.000000e+00 : f32
    %39 = vector.broadcast %cst_13 : f32 to vector<8x8xf32>
    %40 = arith.select %37, %32, %39 : vector<8x8xi1>, vector<8x8xf32>
    %41 = vector.shape_cast %40 : vector<8x8xf32> to vector<1x8x8xf32>
    %cst_14 = arith.constant dense<0.000000e+00> : vector<1xf32>
    %42 = vector.multi_reduction <add>, %41, %cst_14 [1, 2] : vector<1x8x8xf32> to vector<1xf32>
    %43 = vector.shape_cast %42 : vector<1xf32> to vector<1x1x1xf32>
    %44 = vector.extract %43[0, 0, 0] : f32 from vector<1x1x1xf32>
    %45 = arith.addf %38, %44 : f32
    %c0_15 = arith.constant 0 : index
    %46 = memref.load %arg8[%c0_15] : memref<1xf32, #tpu.memory_space<smem>>
    memref.store %45, %arg8[%c0_15] : memref<1xf32, #tpu.memory_space<smem>>
    %cst_16 = arith.constant dense<0xFF800000> : vector<8xf32>
    %47 = vector.multi_reduction <maximumf>, %5, %cst_16 [0] : vector<8x8xf32> to vector<8xf32>
    %48 = vector.shape_cast %47 : vector<8xf32> to vector<1x8xf32>
    %c0_17 = arith.constant 0 : index
    %c0_18 = arith.constant 0 : index
    %49 = vector.load %arg5[%c0_17, %c0_18] : memref<1x8xf32, #tpu.memory_space<vmem>>, vector<1x8xf32>
    %50 = arith.maximumf %49, %48 : vector<1x8xf32>
    %c0_19 = arith.constant 0 : index
    %c0_20 = arith.constant 0 : index
    %51 = vector.load %arg6[%c0_19, %c0_20] : memref<1x8xf32, #tpu.memory_space<vmem>>, vector<1x8xf32>
    %c0_21 = arith.constant 0 : index
    %c0_22 = arith.constant 0 : index
    %52 = vector.load %arg5[%c0_21, %c0_22] : memref<1x8xf32, #tpu.memory_space<vmem>>, vector<1x8xf32>
    %53 = arith.subf %52, %50 : vector<1x8xf32>
    %54 = math.exp %53 : vector<1x8xf32>
    %55 = arith.mulf %51, %54 : vector<1x8xf32>
    %56 = vector.broadcast %50 : vector<1x8xf32> to vector<8x8xf32>
    %57 = arith.subf %5, %56 : vector<8x8xf32>
    %58 = math.exp %57 : vector<8x8xf32>
    %cst_23 = arith.constant dense<0.000000e+00> : vector<8xf32>
    %59 = vector.multi_reduction <add>, %58, %cst_23 [0] : vector<8x8xf32> to vector<8xf32>
    %60 = vector.shape_cast %59 : vector<8xf32> to vector<1x8xf32>
    %61 = arith.addf %55, %60 : vector<1x8xf32>
    %c0_24 = arith.constant 0 : index
    %c0_25 = arith.constant 0 : index
    %62 = vector.load %arg6[%c0_24, %c0_25] : memref<1x8xf32, #tpu.memory_space<vmem>>, vector<1x8xf32>
    tpu.vector_store %arg6[%c0_24, %c0_25], %61 {strides = array<i32>} : memref<1x8xf32, #tpu.memory_space<vmem>>, vector<1x8xf32>,
    %c0_26 = arith.constant 0 : index
    %c0_27 = arith.constant 0 : index
    %63 = vector.load %arg5[%c0_26, %c0_27] : memref<1x8xf32, #tpu.memory_space<vmem>>, vector<1x8xf32>
    tpu.vector_store %arg5[%c0_26, %c0_27], %50 {strides = array<i32>} : memref<1x8xf32, #tpu.memory_space<vmem>>, vector<1x8xf32>,
    %c0_i32_28 = arith.constant 0 : i32
    %64 = arith.cmpi eq, %arg0, %c0_i32_28 : i32
    %65 = arith.extui %64 : i1 to i32
    %c0_i32_29 = arith.constant 0 : i32
    %66 = arith.cmpi ne, %65, %c0_i32_29 : i32
    scf.if %66 {
      %c0_30 = arith.constant 0 : index
      %c0_31 = arith.constant 0 : index
      %67 = vector.load %arg5[%c0_30, %c0_31] : memref<1x8xf32, #tpu.memory_space<vmem>>, vector<1x8xf32>
      %c0_32 = arith.constant 0 : index
      %c0_33 = arith.constant 0 : index
      %68 = vector.load %arg6[%c0_32, %c0_33] : memref<1x8xf32, #tpu.memory_space<vmem>>, vector<1x8xf32>
      %69 = math.log %68 : vector<1x8xf32>
      %70 = arith.addf %67, %69 : vector<1x8xf32>
      %71 = tpu.iota {dimensions = array<i32: 1>} : vector<1x8xi32>
      %c8_i32_34 = arith.constant 8 : i32
      %72 = vector.broadcast %c8_i32_34 : i32 to vector<1x8xi32>
      %73 = arith.cmpi slt, %71, %72 : vector<1x8xi32>
      %cst_35 = arith.constant 0.000000e+00 : f32
      %74 = vector.broadcast %cst_35 : f32 to vector<1x8xf32>
      %75 = arith.select %73, %70, %74 : vector<1x8xi1>, vector<1x8xf32>
      %76 = vector.shape_cast %75 : vector<1x8xf32> to vector<1x1x8xf32>
      %cst_36 = arith.constant dense<0.000000e+00> : vector<1xf32>
      %77 = vector.multi_reduction <add>, %76, %cst_36 [1, 2] : vector<1x1x8xf32> to vector<1xf32>
      %78 = vector.shape_cast %77 : vector<1xf32> to vector<1x1x1xf32>
      %79 = vector.extract %78[0, 0, 0] : f32 from vector<1x1x1xf32>
      %c0_37 = arith.constant 0 : index
      %80 = memref.load %arg8[%c0_37] : memref<1xf32, #tpu.memory_space<smem>>
      %c0_38 = arith.constant 0 : index
      %81 = memref.load %arg7[%c0_38] : memref<1xf32, #tpu.memory_space<smem>>
      %82 = arith.subf %81, %80 : f32
      %cst_39 = arith.constant 1.250000e-01 : f32
      %83 = arith.mulf %82, %cst_39 : f32
      %c0_40 = arith.constant 0 : index
      %84 = memref.load %arg3[%c0_40] : memref<1xf32, #tpu.memory_space<smem>>
      memref.store %83, %arg3[%c0_40] : memref<1xf32, #tpu.memory_space<smem>>
      %85 = arith.subf %79, %80 : f32
      %cst_41 = arith.constant 1.250000e-01 : f32
      %86 = arith.mulf %85, %cst_41 : f32
      %c0_42 = arith.constant 0 : index
      %87 = memref.load %arg4[%c0_42] : memref<1xf32, #tpu.memory_space<smem>>
      memref.store %86, %arg4[%c0_42] : memref<1xf32, #tpu.memory_space<smem>>
    } else {
    }
    return
  }
  func.func @transform_0(%arg0: i32) -> (i32, i32) {
    %c0_i32 = arith.constant 0 : i32
    %c0_i32_0 = arith.constant 0 : i32
    return %arg0, %c0_i32 : i32, i32
  }
  func.func @transform_1(%arg0: i32) -> (i32, i32) {
    %c0_i32 = arith.constant 0 : i32
    return %arg0, %arg0 : i32, i32
  }
  func.func @transform_2(%arg0: i32) -> i32 {
    %c0_i32 = arith.constant 0 : i32
    %c0_i32_0 = arith.constant 0 : i32
    return %c0_i32 : i32
  }
  func.func @transform_3(%arg0: i32) -> i32 {
    %c0_i32 = arith.constant 0 : i32
    %c0_i32_0 = arith.constant 0 : i32
    return %c0_i32 : i32
  }
}

</mosaic_0001>

<bundles_post_ra>
// kernel: tpu_custom_call.1
= control target key start
LH: loop header
LB: loop body
LE: loop exit
PB: predicated region body
PF: predicated region fallthrough
CT: control target
= control target key end

     0   :  { %9 = vsyncpa [#allocation7], 0  ;;  %s333_s0 = inlined_call_operand.hbm [shape: f32[8,8], index: 0, kind: input, shape index: {}]   ;;  %s334_s1 = inlined_call_operand.hbm [shape: f32[8,8], index: 1, kind: input, shape index: {}]   ;;  %s335_s2 = inlined_call_operand.hbm [shape: f32[1], index: 2, kind: output, shape index: {0}]   ;;  %s336_s3 = inlined_call_operand.hbm [shape: f32[1], index: 3, kind: output, shape index: {1}]  }
   0x1   :  { %10 = vsyncpa [#allocation10], 0 }
   0x2   :  { %11 = vsyncpa [#allocation8], 0 }
   0x3   :  { %12 = vsyncpa [#allocation13], 0  ;;  %s286_s12 = smov [#allocation6]   ;;  %s287_s14 = smov [#allocation9]  }
   0x4   :  { %s19_s13 = sshll.u32 %s286_s12, 4  ;;  %s29_s15 = sshll.u32 %s287_s14, 4  ;;  %s20_s13 = int_to_ptr.vmem [resolvable:$true] %s19_s13  ;;  %s30_s15 = int_to_ptr.vmem [resolvable:$true] %s29_s15 }
   0x5   :  { %s230_s16 = scalar_lea.vmem %s20_s13, 128  ;;  %p235_p1 = scmp.lt.s32.totalorder %s20_s13, %s20_s13 }
   0x6   :  { %p231_p0 = scmp.ne.s32.totalorder %s20_s13, %s230_s16  ;;  %p236_p2 = scmp.lt.s32.totalorder %s230_s16, %s230_s16 }
   0x8   :  { %p237_p3 = por %p236_p2, %p235_p1 }
   0xa   :  { %p238_p4 = pnand %p237_p3, %p231_p0 }
   0xc   :  { %241 = shalt.err (!%p238_p4)
}
   0xd   :  { %22 = dma.hbm_to_vmem [thread:$0]  %s333_s0, 128, %s20_s13, [#allocation7]  }
   0xe   :  { %s250_s19 = scalar_lea.vmem %s30_s15, 128  ;;  %p255_p6 = scmp.lt.s32.totalorder %s30_s15, %s30_s15 }
   0xf   :  { %p251_p5 = scmp.ne.s32.totalorder %s30_s15, %s250_s19  ;;  %p256_p7 = scmp.lt.s32.totalorder %s250_s19, %s250_s19 }
  0x11   :  { %p257_p8 = por %p256_p7, %p255_p6 }
  0x13   :  { %p258_p9 = pnand %p257_p8, %p251_p5 }
  0x15   :  { %261 = shalt.err (!%p258_p9)
}
  0x16   :  { %32 = dma.hbm_to_vmem [thread:$0]  %s334_s1, 128, %s30_s15, [#allocation10]  }
  0x17   :  { %278 = dma.done.wait [#allocation7], 128  }
  0x18   :  { %279 = vsyncadd [#allocation7], 4294967168 }
  0x19   :  { %280 = dma.done.wait [#allocation10], 128  }
  0x1a   :  { %281 = vsyncadd [#allocation10], 4294967168  ;;  %v50_v0 = vld [vmem:[#allocation6] sm:$0xff]  ;;  %vm52_vm0 = vcmask 64512   ;;  %vm43_vm1 = vcmask 57344   ;;  %v288_v8 = vmov -inf   ;;  %v66_v10 = vlaneseq }
  0x1b   :  { %v51_v1 = vmul.f32 10.0, %v50_v0  ;;  %44 = vst.msk [vmem:[#allocation2] sm:$0x1] %vm43_vm1, %v288_v8  ;;  %v289_v26 = vmov 0.0   ;;  %v87_v47 = vld [vmem:[#allocation9] sm:$0xff]  ;;  %vm73_vm4 = vcmask 7168  }
  0x1c   :  { %v67_v11 = vshrl.u32 %v66_v10, 7  ;;  %45 = vst.msk [vmem:[#allocation3] sm:$0x1] %vm43_vm1, %v289_v26  ;;  %v90_v39 = vand.u32 127, %v66_v10  ;;  %v88_v49 = vmul.f32 10.0, %v87_v47  ;;  %s290_s27 = smov [#allocation11]  }
  0x1d   :  { %v53_v2 = vsel %vm52_vm0, %v51_v1, -inf  ;;  %s291_s30 = smov [#allocation12]  }
  0x1e   :  { %54 = vmax.xlane.f32.xlu0 %v53_v2  ;;  %v110_v3 = vrot.slane %v53_v2, 4  ;;  %v126_v14 = vsub.s32 0, %v67_v11  ;;  %vm151_vm2 = vcmp.lt.s32.totalorder %v90_v39, 8  ;;  %vm91_vm3 = vcmp.eq.s32.totalorder %v67_v11, %v90_v39 }
  0x1f   :  { %v96_v52 = vsel %vm91_vm3, %v88_v49, 0.0 }
  0x20   :  { %v111_v4 = vmax.f32 %v53_v2, %v110_v3  ;;  %v97_v54 = vsel %vm52_vm0, %v96_v52, 0.0 }
  0x22   :  { %v112_v5 = vrot.slane %v111_v4, 2  ;;  %v116_v12 = vld [vmem:[#allocation2] sm:$0x1] }
  0x23   :  { %v118_v32 = vld [vmem:[#allocation3] sm:$0x1] }
  0x24   :  { %v113_v6 = vmax.f32 %v111_v4, %v112_v5 }
  0x26   :  { %v114_v7 = vrot.slane %v113_v6, 1 }
  0x28   :  { %v115_v9 = vmax.f32 %v113_v6, %v114_v7 }
  0x2a   :  { %v117_v13 = vmax.f32 %v116_v12, %v115_v9 }
  0x2c   :  { %v127_v15 = vrot.slane %v117_v13, %v126_v14  ;;  %142 = vst.msk [vmem:[#allocation2] sm:$0x1] %vm43_vm1, %v117_v13  ;;  %v119_v18 = vsub.f32 %v116_v12, %v117_v13 }
  0x2e   :  { %v129_v16 = vsub.f32 %v51_v1, %v127_v15  ;;  %v120_v19 = vmul.f32 1.442695, %v119_v18 }
  0x30   :  { %v130_v17 = vmul.f32 1.442695, %v129_v16 }
  0x32   :  { %212 = vpow2.f32 %v130_v17 }
  0x33   :  { %214 = vpow2.f32 %v120_v19  ;;  %v146_v41 = vld [vmem:[#allocation2] sm:$0x1] }
  0x3f   :  { %v213_v22 = vpop.eup %212 }
  0x40   :  { %v132_v24 = vsel %vm52_vm0, %v213_v22, 0.0  ;;  %v215_v31 = vpop.eup %214 }
  0x41   :  { %v133_v25 = vrot.slane %v132_v24, 4  ;;  %v122_v33 = vmul.f32 %v215_v31, %v118_v32 }
  0x43   :  { %v134_v27 = vadd.f32 %v133_v25, %v132_v24 }
  0x45   :  { %v135_v28 = vrot.slane %v134_v27, 2 }
  0x47   :  { %v136_v29 = vadd.f32 %v135_v28, %v134_v27 }
  0x49   :  { %v137_v30 = vrot.slane %v136_v29, 1 }
  0x4b   :  { %v138_v34 = vadd.f32 %v137_v30, %v136_v29 }
  0x4d   :  { %v139_v35 = vadd.f32 %v138_v34, %v122_v33 }
  0x4f   :  { %141 = vst.msk [vmem:[#allocation3] sm:$0x1] %vm43_vm1, %v139_v35 }
  0x56   :  { %v147_v38 = vld [vmem:[#allocation3] sm:$0x1] }
  0xa7   :  { %v55_v20 = vpop.xlane.xlu0 %54 }
  0xa8   :  { %v56_v21 = vsub.f32 %v51_v1, %v55_v20 }
  0xaa   :  { %v57_v23 = vmul.f32 1.442695, %v56_v21 }
  0xac   :  { %216 = vpow2.f32 %v57_v23 }
  0xad   :  { %218 = vlog2.f32 %v147_v38 }
  0xb9   :  { %v217_v36 = vpop.eup %216 }
  0xba   :  { %v59_v37 = vsel %vm52_vm0, %v217_v36, 0.0  ;;  %v219_v40 = vpop.eup %218 }
  0xbb   :  { %60 = vadd.xlane.f32.xlu0 %v59_v37  ;;  %v149_v42 = vmul.f32 0.6931472, %v219_v40 }
  0xbd   :  { %v150_v43 = vadd.f32 %v149_v42, %v146_v41 }
  0xbf   :  { %v152_v44 = vsel %vm151_vm2, %v150_v43, 0.0 }
  0xc0   :  { %v153_v45 = vsel %vm43_vm1, %v152_v44, 0.0 }
  0xc1   :  { %154 = vadd.xlane.f32.xlu0 %v153_v45 }
 0x144   :  { %v61_v46 = vpop.xlane.xlu0 %60 }
 0x145   :  { %220 = vlog2.f32 %v61_v46 }
 0x14a   :  { %v155_v55 = vpop.xlane.xlu0 %154 }
 0x14b   :  { %v156_v56 = vrot.slane %v155_v55, 4 }
 0x14d   :  { %v157_v57 = vadd.f32 %v156_v56, %v155_v55 }
 0x14f   :  { %v158_v61 = vrot.slane %v157_v57, 2 }
 0x151   :  { %v159_v3 = vadd.f32 %v158_v61, %v157_v57 }
 0x152   :  { %v221_v48 = vpop.eup %220 }
 0x153   :  { %v63_v50 = vmul.f32 0.6931472, %v221_v48  ;;  %v160_v8 = vrot.slane %v159_v3, 1 }
 0x155   :  { %v64_v51 = vadd.f32 %v63_v50, %v55_v20  ;;  %v161_v11 = vadd.f32 %v160_v8, %v159_v3 }
 0x157   :  { %v74_v53 = vsel %vm73_vm4, %v64_v51, 0.0 }
 0x158   :  { %75 = vadd.xlane.f32.xlu1 %v74_v53 }
 0x15c   :  { %98 = vadd.xlane.f32.xlu1 %v97_v54 }
 0x1e1   :  { %v76_v58 = vpop.xlane.xlu1 %75 }
 0x1e2   :  { %v77_v59 = vrot.slane %v76_v58, 4 }
 0x1e4   :  { %v78_v60 = vadd.f32 %v77_v59, %v76_v58 }
 0x1e5   :  { %v99_v62 = vpop.xlane.xlu1 %98 }
 0x1e6   :  { %v79_v63 = vrot.slane %v78_v60, 2  ;;  %v100_v0 = vrot.slane %v99_v62, 4 }
 0x1e8   :  { %v101_v1 = vadd.f32 %v100_v0, %v99_v62  ;;  %v80_v2 = vadd.f32 %v79_v63, %v78_v60 }
 0x1ea   :  { %v102_v4 = vrot.slane %v101_v1, 2  ;;  %v81_v5 = vrot.slane %v80_v2, 1 }
 0x1ec   :  { %v103_v6 = vadd.f32 %v102_v4, %v101_v1  ;;  %v82_v7 = vadd.f32 %v81_v5, %v80_v2 }
 0x1ee   :  { %200 = vpush %v82_v7  ;;  %v104_v9 = vrot.slane %v103_v6, 1 }
 0x1f0   :  { %v105_v10 = vadd.f32 %v104_v9, %v103_v6 }
 0x1f2   :  { %202 = vpush %v105_v10 }
 0x1f3   :  { %204 = vpush %v161_v11 }
 0x21f   :  { %s201_s0 = spop %200 }
 0x223   :  { %s203_s1 = spop %202 }
 0x224   :  { %s165_s22 = ssub.f32 %s201_s0, %s203_s1  ;;  %s205_s23 = spop %204 }
 0x225   :  { %s169_s24 = ssub.f32 %s205_s23, %s203_s1 }
 0x226   :  { %s166_s25 = smul.f32 0.125, %s165_s22 }
 0x227   :  { %s170_s26 = smul.f32 0.125, %s169_s24 }
 0x228   :  { %168 = sst [smem:[#allocation11]] %s166_s25 }
 0x229   :  { %180 = dma.smem_to_hbm %s290_s27, 16, %s335_s2, [#allocation8]  }
 0x22a   :  { %172 = sst [smem:[#allocation12]] %s170_s26 }
 0x22b   :  { %188 = dma.smem_to_hbm %s291_s30, 16, %s336_s3, [#allocation13]  }
 0x22c   :  { %282 = dma.done.wait [#allocation8], 16  }
 0x22d   :  { %283 = vsyncadd [#allocation8], 4294967280 }
 0x22e   :  { %284 = dma.done.wait [#allocation13], 16  }
 0x22f   :  { %285 = vsyncadd [#allocation13], 4294967280 }
 0x230   :  { %195 = sfence }
 0x231   :  { %196 = vsyncpa [#allocation7], 1 }
 0x232   :  { %197 = vsyncpa [#allocation10], 1 }
 0x233   :  { %198 = vsyncpa [#allocation8], 1 }
 0x234   :  { %199 = vsyncpa [#allocation13], 1 }

</bundles_post_ra>
